<compile_context>
chip_gen: v5e
topology: v5e:2x2
jax: 0.10.0
libtpu: 0.0.40
codegen_flags: <defaults>
</compile_context>

<pallas_src>
import math

import jax
import jax.numpy as jnp
from jax import lax
from jax.experimental import pallas as pl
from jax.experimental.pallas import tpu as pltpu


def luong_attention_kernel(
    h_ref,      # (1, H)   decoder hidden state (this batch row)
    x_ref,      # (1, E)   decoder input embedding (this batch row)
    ctx_ref,    # (S, H)   encoder states for this batch row (self.context[b])
    w_in_ref,   # (H, H)   linear_in.weight.T   (gamma = h @ w_in + b_in)
    b_in_ref,   # (1, H)
    wc_ref,     # (H, H)   linear_out.weight[:, :H].T
    wh_ref,     # (H, H)   linear_out.weight[:, H:2H].T
    wx_ref,     # (E, H)   linear_out.weight[:, 2H:].T
    b_out_ref,  # (1, H)
    out_ref,    # (1, H)
    wts_ref,    # (1, S)
):
    h = h_ref[...]
    x = x_ref[...]
    ctx = ctx_ref[...]

    # gamma = linear_in(h)                                  -> (1, H)   [MXU]
    gamma = jnp.dot(h, w_in_ref[...], preferred_element_type=jnp.float32)
    gamma = gamma + b_in_ref[...]

    # scores[s] = <context[b, s, :], gamma>                 -> (1, S)   [MXU, contract H]
    scores = lax.dot_general(
        gamma, ctx,
        dimension_numbers=(((1,), (1,)), ((), ())),
        preferred_element_type=jnp.float32)

    # softmax over S (max-stabilized; exp on EUP, approx reciprocal on EUP)
    m = jnp.max(scores, axis=-1, keepdims=True)
    e = jnp.exp(scores - m)
    denom = jnp.sum(e, axis=-1, keepdims=True)
    w = e * pl.reciprocal(denom, approx=True)               # (1, S)
    wts_ref[...] = w

    # c_t = weights @ context                               -> (1, H)   [MXU]
    c_t = jnp.dot(w, ctx, preferred_element_type=jnp.float32)

    # output = tanh([c_t, h, x] @ W_out.T + b_out); concat split into three
    # algebraically-exact matmuls (no in-kernel lane concatenation).
    pre = (
        jnp.dot(c_t, wc_ref[...], preferred_element_type=jnp.float32)
        + jnp.dot(h, wh_ref[...], preferred_element_type=jnp.float32)
        + jnp.dot(x, wx_ref[...], preferred_element_type=jnp.float32)
        + b_out_ref[...]
    )
    out_ref[...] = jnp.tanh(pre)


def init_context(context_sbh):
    """Mirror PyTorch init_context: one-time (S, B, H) -> (B, S, H) transpose.

    This is setup glue (outside the hot forward path), exactly as in the module,
    so the forward kernel never pays an extra HBM transpose of its largest operand.
    """
    return jnp.transpose(context_sbh, (1, 0, 2))


def luong_attention_forward(h, x, context_bsh, params):
    """Forward pass. `context_bsh` is the module's self.context, shape (B, S, H)."""
    B, H = h.shape
    E = x.shape[1]
    S = context_bsh.shape[1]

    # Pre-transpose / split weights once in plain JAX (glue; tiny tensors).
    w_in_T = params["w_in"].T                  # (H, H)
    wc = params["w_out"][:, :H].T              # (H, H)
    wh = params["w_out"][:, H:2 * H].T         # (H, H)
    wx = params["w_out"][:, 2 * H:].T          # (E, H)
    b_in_2d = params["b_in"].reshape(1, H)
    b_out_2d = params["b_out"].reshape(1, H)

    # Unit-dim reshapes so every per-batch block's last two dims equal the full
    # array dims (keeps the (8,128) block constraint trivially satisfied while
    # gridding over batch). Lane (last) dim is untouched.
    h3 = h.reshape(B, 1, H)
    x3 = x.reshape(B, 1, E)

    # Explicit VMEM budget: double-buffered ctx row + resident weights, with margin.
    est = 4 * (2 * S * H + 3 * H * H + E * H + 16 * (H + E + S))
    vmem_limit = int(min(32 * 1024 * 1024, max(2 * est + (1 << 20), 16 * 1024 * 1024)))

    row = lambda b: (b, 0, 0)     # per-batch-row blocks
    fixed = lambda b: (0, 0)      # resident weights / biases

    out3, wts3 = pl.pallas_call(
        luong_attention_kernel,
        grid=(B,),
        in_specs=[
            pl.BlockSpec((None, 1, H), row),     # h        -> (1, H)
            pl.BlockSpec((None, 1, E), row),     # x        -> (1, E)
            pl.BlockSpec((None, S, H), row),     # context  -> (S, H), pipelined over batch
            pl.BlockSpec((H, H), fixed),         # w_in.T   (resident)
            pl.BlockSpec((1, H), fixed),         # b_in
            pl.BlockSpec((H, H), fixed),         # wc
            pl.BlockSpec((H, H), fixed),         # wh
            pl.BlockSpec((E, H), fixed),         # wx
            pl.BlockSpec((1, H), fixed),         # b_out
        ],
        out_specs=(
            pl.BlockSpec((None, 1, H), row),     # output   -> (1, H)
            pl.BlockSpec((None, 1, S), row),     # weights  -> (1, S)
        ),
        out_shape=(
            jax.ShapeDtypeStruct((B, 1, H), jnp.float32),
            jax.ShapeDtypeStruct((B, 1, S), jnp.float32),
        ),
        compiler_params=pltpu.CompilerParams(
            dimension_semantics=("parallel",),
            vmem_limit_bytes=vmem_limit,
        ),
    )(h3, x3, context_bsh, w_in_T, b_in_2d, wc, wh, wx, b_out_2d)

    return out3.reshape(B, H), wts3.reshape(B, S)


def reference_forward(h, x, context_bsh, params):
    """Pure-JAX reference mirroring the PyTorch module (pool_size=0)."""
    gamma = h @ params["w_in"].T + params["b_in"]             # (B, H)
    scores = jnp.einsum("bsh,bh->bs", context_bsh, gamma)     # (B, S)
    w = jax.nn.softmax(scores, axis=1)
    c_t = jnp.einsum("bs,bsh->bh", w, context_bsh)            # (B, H)
    cat = jnp.concatenate([c_t, h, x], axis=1)                # (B, 2H+E)
    out = jnp.tanh(cat @ params["w_out"].T + params["b_out"])
    return out, w


def init_params(key, hidden_size, emb_size):
    """Deterministic init mimicking nn.Linear default (uniform +-1/sqrt(fan_in))."""
    k1, k2, k3, k4 = jax.random.split(key, 4)
    bnd_in = 1.0 / math.sqrt(hidden_size)
    in_out = 2 * hidden_size + emb_size
    bnd_out = 1.0 / math.sqrt(in_out)
    return {
        "w_in": jax.random.uniform(k1, (hidden_size, hidden_size),
                                   jnp.float32, -bnd_in, bnd_in),
        "b_in": jax.random.uniform(k2, (hidden_size,),
                                   jnp.float32, -bnd_in, bnd_in),
        "w_out": jax.random.uniform(k3, (hidden_size, in_out),
                                    jnp.float32, -bnd_out, bnd_out),
        "b_out": jax.random.uniform(k4, (hidden_size,),
                                    jnp.float32, -bnd_out, bnd_out),
    }


if __name__ == "__main__":
    B, S, H, E = 2, 8, 32, 16

    key = jax.random.PRNGKey(0)
    kp, kh, kx, kc = jax.random.split(key, 4)

    params = init_params(kp, H, E)
    h = jax.random.normal(kh, (B, H), jnp.float32)
    x = jax.random.normal(kx, (B, E), jnp.float32)
    context_sbh = jax.random.normal(kc, (S, B, H), jnp.float32)  # PyTorch (S, B, H)

    # One-time context setup (as in the PyTorch module's init_context).
    ctx_bsh = init_context(context_sbh)                          # (B, S, H)

    out, wts = luong_attention_forward(h, x, ctx_bsh, params)
    out = jax.block_until_ready(out)
    wts = jax.block_until_ready(wts)

    ref_out, ref_wts = reference_forward(h, x, ctx_bsh, params)
    assert out.shape == (B, H) and wts.shape == (B, S)
    # Tolerance loosened slightly vs 1e-5 because of pl.reciprocal(approx=True).
    assert jnp.allclose(wts, ref_wts, atol=1e-3, rtol=1e-3)
    assert jnp.allclose(out, ref_out, atol=1e-3, rtol=1e-3)

    print("KERNEL_OK")
</pallas_src>

<mosaic_0001>
module attributes {stable_mosaic.version = 11 : i64} {
  func.func @luong_attention_kernel(%arg0: i32, %arg1: memref<1x1x32xf32, #tpu.memory_space<vmem>>, %arg2: memref<1x1x16xf32, #tpu.memory_space<vmem>>, %arg3: memref<1x8x32xf32, #tpu.memory_space<vmem>>, %arg4: memref<32x32xf32, #tpu.memory_space<vmem>>, %arg5: memref<1x32xf32, #tpu.memory_space<vmem>>, %arg6: memref<32x32xf32, #tpu.memory_space<vmem>>, %arg7: memref<32x32xf32, #tpu.memory_space<vmem>>, %arg8: memref<16x32xf32, #tpu.memory_space<vmem>>, %arg9: memref<1x32xf32, #tpu.memory_space<vmem>>, %arg10: memref<1x1x32xf32, #tpu.memory_space<vmem>>, %arg11: memref<1x1x8xf32, #tpu.memory_space<vmem>>) attributes {dimension_semantics = [#tpu.dimension_semantics<parallel>], iteration_bounds = array<i64: 2>, scalar_prefetch = 0 : i64, scratch_operands = 0 : i64, tpu.core_type = #tpu.core_type<tc>, window_params = [{transform_indices = @transform_0, window_bounds = array<i64: 1, 1, 32>}, {transform_indices = @transform_1, window_bounds = array<i64: 1, 1, 16>}, {transform_indices = @transform_2, window_bounds = array<i64: 1, 8, 32>}, {pipeline_mode = #tpu.pipeline_mode<synchronous>, transform_indices = @transform_3, window_bounds = array<i64: 32, 32>}, {pipeline_mode = #tpu.pipeline_mode<synchronous>, transform_indices = @transform_4, window_bounds = array<i64: 1, 32>}, {pipeline_mode = #tpu.pipeline_mode<synchronous>, transform_indices = @transform_5, window_bounds = array<i64: 32, 32>}, {pipeline_mode = #tpu.pipeline_mode<synchronous>, transform_indices = @transform_6, window_bounds = array<i64: 32, 32>}, {pipeline_mode = #tpu.pipeline_mode<synchronous>, transform_indices = @transform_7, window_bounds = array<i64: 16, 32>}, {pipeline_mode = #tpu.pipeline_mode<synchronous>, transform_indices = @transform_8, window_bounds = array<i64: 1, 32>}, {transform_indices = @transform_9, window_bounds = array<i64: 1, 1, 32>}, {transform_indices = @transform_10, window_bounds = array<i64: 1, 1, 8>}]} {
    %c0 = arith.constant 0 : index
    %c0_0 = arith.constant 0 : index
    %c0_1 = arith.constant 0 : index
    %0 = vector.load %arg1[%c0, %c0_0, %c0_1] : memref<1x1x32xf32, #tpu.memory_space<vmem>>, vector<1x1x32xf32>
    %1 = vector.shape_cast %0 : vector<1x1x32xf32> to vector<1x32xf32>
    %c0_2 = arith.constant 0 : index
    %c0_3 = arith.constant 0 : index
    %c0_4 = arith.constant 0 : index
    %2 = vector.load %arg2[%c0_2, %c0_3, %c0_4] : memref<1x1x16xf32, #tpu.memory_space<vmem>>, vector<1x1x16xf32>
    %3 = vector.shape_cast %2 : vector<1x1x16xf32> to vector<1x16xf32>
    %c0_5 = arith.constant 0 : index
    %c0_6 = arith.constant 0 : index
    %c0_7 = arith.constant 0 : index
    %4 = vector.load %arg3[%c0_5, %c0_6, %c0_7] : memref<1x8x32xf32, #tpu.memory_space<vmem>>, vector<1x8x32xf32>
    %5 = vector.shape_cast %4 : vector<1x8x32xf32> to vector<8x32xf32>
    %c0_8 = arith.constant 0 : index
    %c0_9 = arith.constant 0 : index
    %6 = vector.load %arg4[%c0_8, %c0_9] : memref<32x32xf32, #tpu.memory_space<vmem>>, vector<32x32xf32>
    %cst = arith.constant dense<0.000000e+00> : vector<1x32xf32>
    %7 = tpu.matmul %1, %6, %cst {dimension_numbers = #tpu.dot_dimension_numbers<[1], [0], [0], [1], [0, 0, 1, 1], [], []>} : vector<1x32xf32>, vector<32x32xf32>, vector<1x32xf32> -> vector<1x32xf32>
    %c0_10 = arith.constant 0 : index
    %c0_11 = arith.constant 0 : index
    %8 = vector.load %arg5[%c0_10, %c0_11] : memref<1x32xf32, #tpu.memory_space<vmem>>, vector<1x32xf32>
    %9 = arith.addf %7, %8 : vector<1x32xf32>
    %cst_12 = arith.constant dense<0.000000e+00> : vector<1x8xf32>
    %10 = tpu.matmul %9, %5, %cst_12 {dimension_numbers = #tpu.dot_dimension_numbers<[1], [1], [0], [0], [0, 0, 1, 0], [], []>} : vector<1x32xf32>, vector<8x32xf32>, vector<1x8xf32> -> vector<1x8xf32>
    %cst_13 = arith.constant dense<0xFF800000> : vector<1xf32>
    %11 = vector.multi_reduction <maximumf>, %10, %cst_13 [1] : vector<1x8xf32> to vector<1xf32>
    %12 = vector.shape_cast %11 : vector<1xf32> to vector<1x1xf32>
    %13 = vector.broadcast %12 : vector<1x1xf32> to vector<1x8xf32>
    %14 = arith.subf %10, %13 : vector<1x8xf32>
    %15 = math.exp %14 : vector<1x8xf32>
    %cst_14 = arith.constant dense<0.000000e+00> : vector<1xf32>
    %16 = vector.multi_reduction <add>, %15, %cst_14 [1] : vector<1x8xf32> to vector<1xf32>
    %17 = vector.shape_cast %16 : vector<1xf32> to vector<1x1xf32>
    %18 = tpu.reciprocal %17 {approx = true} : vector<1x1xf32> -> vector<1x1xf32>
    %19 = vector.broadcast %18 : vector<1x1xf32> to vector<1x8xf32>
    %20 = arith.mulf %15, %19 : vector<1x8xf32>
    %c0_15 = arith.constant 0 : index
    %c0_16 = arith.constant 0 : index
    %c0_17 = arith.constant 0 : index
    %21 = vector.load %arg11[%c0_15, %c0_16, %c0_17] : memref<1x1x8xf32, #tpu.memory_space<vmem>>, vector<1x1x8xf32>
    %22 = vector.shape_cast %21 : vector<1x1x8xf32> to vector<1x8xf32>
    %23 = vector.shape_cast %20 : vector<1x8xf32> to vector<1x1x8xf32>
    tpu.vector_store %arg11[%c0_15, %c0_16, %c0_17], %23 {strides = array<i32>} : memref<1x1x8xf32, #tpu.memory_space<vmem>>, vector<1x1x8xf32>,
    %cst_18 = arith.constant dense<0.000000e+00> : vector<1x32xf32>
    %24 = tpu.matmul %20, %5, %cst_18 {dimension_numbers = #tpu.dot_dimension_numbers<[1], [0], [0], [1], [0, 0, 1, 1], [], []>} : vector<1x8xf32>, vector<8x32xf32>, vector<1x32xf32> -> vector<1x32xf32>
    %c0_19 = arith.constant 0 : index
    %c0_20 = arith.constant 0 : index
    %25 = vector.load %arg6[%c0_19, %c0_20] : memref<32x32xf32, #tpu.memory_space<vmem>>, vector<32x32xf32>
    %cst_21 = arith.constant dense<0.000000e+00> : vector<1x32xf32>
    %26 = tpu.matmul %24, %25, %cst_21 {dimension_numbers = #tpu.dot_dimension_numbers<[1], [0], [0], [1], [0, 0, 1, 1], [], []>} : vector<1x32xf32>, vector<32x32xf32>, vector<1x32xf32> -> vector<1x32xf32>
    %c0_22 = arith.constant 0 : index
    %c0_23 = arith.constant 0 : index
    %27 = vector.load %arg7[%c0_22, %c0_23] : memref<32x32xf32, #tpu.memory_space<vmem>>, vector<32x32xf32>
    %cst_24 = arith.constant dense<0.000000e+00> : vector<1x32xf32>
    %28 = tpu.matmul %1, %27, %cst_24 {dimension_numbers = #tpu.dot_dimension_numbers<[1], [0], [0], [1], [0, 0, 1, 1], [], []>} : vector<1x32xf32>, vector<32x32xf32>, vector<1x32xf32> -> vector<1x32xf32>
    %29 = arith.addf %26, %28 : vector<1x32xf32>
    %c0_25 = arith.constant 0 : index
    %c0_26 = arith.constant 0 : index
    %30 = vector.load %arg8[%c0_25, %c0_26] : memref<16x32xf32, #tpu.memory_space<vmem>>, vector<16x32xf32>
    %cst_27 = arith.constant dense<0.000000e+00> : vector<1x32xf32>
    %31 = tpu.matmul %3, %30, %cst_27 {dimension_numbers = #tpu.dot_dimension_numbers<[1], [0], [0], [1], [0, 0, 1, 1], [], []>} : vector<1x16xf32>, vector<16x32xf32>, vector<1x32xf32> -> vector<1x32xf32>
    %32 = arith.addf %29, %31 : vector<1x32xf32>
    %c0_28 = arith.constant 0 : index
    %c0_29 = arith.constant 0 : index
    %33 = vector.load %arg9[%c0_28, %c0_29] : memref<1x32xf32, #tpu.memory_space<vmem>>, vector<1x32xf32>
    %34 = arith.addf %32, %33 : vector<1x32xf32>
    %35 = math.tanh %34 : vector<1x32xf32>
    %c0_30 = arith.constant 0 : index
    %c0_31 = arith.constant 0 : index
    %c0_32 = arith.constant 0 : index
    %36 = vector.load %arg10[%c0_30, %c0_31, %c0_32] : memref<1x1x32xf32, #tpu.memory_space<vmem>>, vector<1x1x32xf32>
    %37 = vector.shape_cast %36 : vector<1x1x32xf32> to vector<1x32xf32>
    %38 = vector.shape_cast %35 : vector<1x32xf32> to vector<1x1x32xf32>
    tpu.vector_store %arg10[%c0_30, %c0_31, %c0_32], %38 {strides = array<i32>} : memref<1x1x32xf32, #tpu.memory_space<vmem>>, vector<1x1x32xf32>,
    return
  }
  func.func @transform_0(%arg0: i32) -> (i32, i32, i32) {
    %c0_i32 = arith.constant 0 : i32
    %c0_i32_0 = arith.constant 0 : i32
    %c0_i32_1 = arith.constant 0 : i32
    return %arg0, %c0_i32, %c0_i32_0 : i32, i32, i32
  }
  func.func @transform_1(%arg0: i32) -> (i32, i32, i32) {
    %c0_i32 = arith.constant 0 : i32
    %c0_i32_0 = arith.constant 0 : i32
    %c0_i32_1 = arith.constant 0 : i32
    return %arg0, %c0_i32, %c0_i32_0 : i32, i32, i32
  }
  func.func @transform_2(%arg0: i32) -> (i32, i32, i32) {
    %c0_i32 = arith.constant 0 : i32
    %c0_i32_0 = arith.constant 0 : i32
    %c0_i32_1 = arith.constant 0 : i32
    return %arg0, %c0_i32, %c0_i32_0 : i32, i32, i32
  }
  func.func @transform_3(%arg0: i32) -> (i32, i32) {
    %c0_i32 = arith.constant 0 : i32
    %c0_i32_0 = arith.constant 0 : i32
    %c0_i32_1 = arith.constant 0 : i32
    return %c0_i32, %c0_i32_0 : i32, i32
  }
  func.func @transform_4(%arg0: i32) -> (i32, i32) {
    %c0_i32 = arith.constant 0 : i32
    %c0_i32_0 = arith.constant 0 : i32
    %c0_i32_1 = arith.constant 0 : i32
    return %c0_i32, %c0_i32_0 : i32, i32
  }
  func.func @transform_5(%arg0: i32) -> (i32, i32) {
    %c0_i32 = arith.constant 0 : i32
    %c0_i32_0 = arith.constant 0 : i32
    %c0_i32_1 = arith.constant 0 : i32
    return %c0_i32, %c0_i32_0 : i32, i32
  }
  func.func @transform_6(%arg0: i32) -> (i32, i32) {
    %c0_i32 = arith.constant 0 : i32
    %c0_i32_0 = arith.constant 0 : i32
    %c0_i32_1 = arith.constant 0 : i32
    return %c0_i32, %c0_i32_0 : i32, i32
  }
  func.func @transform_7(%arg0: i32) -> (i32, i32) {
    %c0_i32 = arith.constant 0 : i32
    %c0_i32_0 = arith.constant 0 : i32
    %c0_i32_1 = arith.constant 0 : i32
    return %c0_i32, %c0_i32_0 : i32, i32
  }
  func.func @transform_8(%arg0: i32) -> (i32, i32) {
    %c0_i32 = arith.constant 0 : i32
    %c0_i32_0 = arith.constant 0 : i32
    %c0_i32_1 = arith.constant 0 : i32
    return %c0_i32, %c0_i32_0 : i32, i32
  }
  func.func @transform_9(%arg0: i32) -> (i32, i32, i32) {
    %c0_i32 = arith.constant 0 : i32
    %c0_i32_0 = arith.constant 0 : i32
    %c0_i32_1 = arith.constant 0 : i32
    return %arg0, %c0_i32, %c0_i32_0 : i32, i32, i32
  }
  func.func @transform_10(%arg0: i32) -> (i32, i32, i32) {
    %c0_i32 = arith.constant 0 : i32
    %c0_i32_0 = arith.constant 0 : i32
    %c0_i32_1 = arith.constant 0 : i32
    return %arg0, %c0_i32, %c0_i32_0 : i32, i32, i32
  }
}

</mosaic_0001>

<bundles_post_ra>
// kernel: tpu_custom_call.1
= control target key start
LH: loop header
LB: loop body
LE: loop exit
PB: predicated region body
PF: predicated region fallthrough
CT: control target
= control target key end

     0   :  { %s1668_s0 = inlined_call_operand.hbm [shape: f32[2,1,32], index: 0, kind: input, shape index: {}]   ;;  %s1669_s1 = inlined_call_operand.hbm [shape: f32[2,1,16], index: 1, kind: input, shape index: {}]   ;;  %s1670_s2 = inlined_call_operand.hbm [shape: f32[2,8,32], index: 2, kind: input, shape index: {}]   ;;  %s1671_s3 = inlined_call_operand.hbm [shape: f32[32,32], index: 3, kind: input, shape index: {}]   ;;  %s1672_s4 = inlined_call_operand.vmem [shape: f32[1,32], index: 4, kind: input, shape index: {}]   ;;  %s1673_s5 = inlined_call_operand.hbm [shape: f32[32,32], index: 5, kind: input, shape index: {}]   ;;  %s1674_s6 = inlined_call_operand.hbm [shape: f32[32,32], index: 6, kind: input, shape index: {}]   ;;  %s1675_s7 = inlined_call_operand.hbm [shape: f32[16,32], index: 7, kind: input, shape index: {}]   ;;  %s1676_s8 = inlined_call_operand.vmem [shape: f32[1,32], index: 8, kind: input, shape index: {}]   ;;  %s1677_s9 = inlined_call_operand.hbm [shape: f32[2,1,32], index: 9, kind: output, shape index: {0}]   ;;  %s1678_s10 = inlined_call_operand.hbm [shape: f32[2,1,8], index: 10, kind: output, shape index: {1}]  }
   0x1   :  { %1688 = sst [smem:[#allocation27_spill]] %s1669_s1 }
   0x2   :  { %1689 = sst [smem:[#allocation28_spill]] %s1671_s3 }
   0x3   :  { %1690 = sst [smem:[#allocation29_spill]] %s1673_s5 }
   0x4   :  { %1691 = sst [smem:[#allocation30_spill]] %s1674_s6 }
   0x5   :  { %1692 = sst [smem:[#allocation31_spill]] %s1675_s7 }
   0x6   :  { %16 = vsyncpa [#allocation3], 0 }
   0x7   :  { %18 = vsyncpa [#allocation3 + $0x1], 0 }
   0x8   :  { %19 = vsyncpa [#allocation6], 0 }
   0x9   :  { %21 = vsyncpa [#allocation6 + $0x1], 0 }
   0xa   :  { %22 = vsyncpa [#allocation9], 0 }
   0xb   :  { %23 = vsyncpa [#allocation12], 0 }
   0xc   :  { %24 = vsyncpa [#allocation4], 0 }
   0xd   :  { %26 = vsyncpa [#allocation4 + $0x1], 0 }
   0xe   :  { %27 = vsyncpa [#allocation16], 0 }
   0xf   :  { %29 = vsyncpa [#allocation16 + $0x1], 0  ;;  %s1411_s13 = smov 0   ;;  %s1413_s14 = smov 0  }
  0x10   :  { %s1415_s15 = smov 0   ;;  %s1417_s16 = smov 0  }
  0x11 LB: > { %1693 = sst [smem:[#allocation23_spill]] %s1344_s15  ;;  %s1435_s20 = sadd.s32 4294967295, %s1348_s16   ;;  %s1348_s16 = sphi %s1417_s16, %s1716_s16   ;;  %s1344_s15 = sphi %s1415_s15, %s1718_s15   ;;  %s1340_s14 = sphi %s1413_s14, %s1720_s14   ;;  %s1336_s13 = sphi %s1411_s13, %s1719_s13  }
  0x12   : > { %s1694_s3 = sld [smem:[#allocation28_spill]]  ;;  %p895_p0 = scmp.ge.s32.totalorder %s1348_s16, 1 }
  0x13   : > { %p1686_p1 = scmp.eq.s32.totalorder %s1435_s20, 0  ;;  %p296_p2 = scmp.lt.s32.totalorder %s1348_s16, 3 }
  0x14   : > { %s1350_s22 = smov [#allocation8]   ;;  %s1696_s6 = sld [smem:[#allocation30_spill]] }
  0x15   : > { %p1440_p3 = pnand %p895_p0, %p296_p2  ;;  %s309_s23 = sshll.u32 %s1350_s22, 4  ;;  %s310_s23 = int_to_ptr.vmem [resolvable:$true] %s309_s23 }
  0x16   : > { %s1351_s28 = smov [#allocation11]   ;;  %s1679_s30 = smov 128  }
  0x17   : > { %p944_p4 = pneg %p1440_p3  ;;  %s340_s29 = sshll.u32 %s1351_s28, 4  ;;  %s341_s29 = int_to_ptr.vmem [resolvable:$true] %s340_s29 }
  0x18   : > { %s307_s19 = sshll.u32 %s1694_s3, 4  ;;  %s1681_s11 = smov 8   ;;  %s308_s19 = int_to_ptr.hbm [resolvable:$true] %s307_s19 }
  0x19   : > { %p1452_p6 = pnand %p944_p4, %p1686_p1  ;;  %s894_s12 = sadd.s32 4294967294, %s1348_s16  }
  0x1a   : > { %s338_s26 = sshll.u32 %s1696_s6, 4  ;;  %s1468_s17 = sadd.s32 1, %s1348_s16   ;;  %s339_s26 = int_to_ptr.hbm [resolvable:$true] %s338_s26 }
  0x1b   : > { %947 = dma.hbm_to_vmem [thread:$0]  (!%p1452_p6), %s308_s19, 512, %s310_s23, [#allocation9], %s1679_s30, %s1679_s30, %s1681_s11  }
  0x1c   : > { %953 = dma.hbm_to_vmem [thread:$0]  (!%p1452_p6), %s339_s26, 512, %s341_s29, [#allocation12], %s1679_s30, %s1679_s30, %s1681_s11  }
  0x1d   : > { %1698 = sst [smem:[#allocation24_spill]] %s1468_s17  ;;  %s39_s18 = ssub.s32 %s1348_s16, %s1468_s17 }
  0x1e   : > { %s42_s22 = sadd.s32 1, %s1344_s15  ;;  %p40_p7 = scmp.eq.s32.totalorder %s39_s18, 0 }
  0x1f   : > { %p49_p8 = scmp.ne.s32.totalorder %s1344_s15, %s1340_s14  ;;  %p50_p9 = scmp.eq.s32.totalorder %s1348_s16, 0 }
  0x20   : > { %p55_p10 = scmp.ne.s32.totalorder %s1340_s14, %s1336_s13  ;;  %p257_p13 = scmp.eq.s32.totalorder %s1435_s20, 1 }
  0x21   : > { %s1479_s19 = scalar_select %p40_p7, %s1344_s15, %s42_s22  }
  0x22   : > { %p51_p11 = por %p50_p9, %p49_p8  ;;  %p1483_p12 = por %p1686_p1, %p55_p10 }
  0x23   : > { %1699 = sst [smem:[#allocation25_spill]] %s1479_s19  ;;  %p263_p0 = scmp.eq.s32.totalorder %s894_s12, 1 }
  0x24   : > { %p978_p2 = scmp.lt.s32.totalorder %s1348_s16, 2  ;;  %s1490_s24 = sand.u32 1, %s1344_s15  }
  0x25   : > { %p1492_p4 = por %p257_p13, %p49_p8  ;;  %p1496_p5 = por %p263_p0, %p55_p10 }
  0x26   : > { %p1500_p7 = pnand %p978_p2, %p51_p11  ;;  %s388_s29 = sand.u32 1, %s1348_s16  }
  0x27   : > { %s1702_s26 = scalar_select %p1496_p5, 1, 0 }
  0x28   : > { %s1705_s1 = sld [smem:[#allocation27_spill]]  ;;  %s391_s11 = scalar_lea.vmem [#allocation5], %s1490_s24 }
  0x29   : > { %1703 = sst [smem:[#allocation26_spill]] %s1702_s26  ;;  %s398_s3 = sshll.u32 %s391_s11, 4  ;;  %s399_s3 = int_to_ptr.vmem [resolvable:$true] %s398_s3 }
  0x2a   : > { %s1510_s6 = scalar_lea.sflag [#allocation6], %s388_s29  ;;  %p1092_p9 = pneg %p1500_p7 }
  0x2e   : > { %s394_s22 = scalar_lea.hbm %s1705_s1, %s1348_s16  ;;  %s1095_s18 = scalar_lea.hbm %s1705_s1, 2 }
  0x2f   : > { %s396_s30 = sshll.u32 %s394_s22, 4  ;;  %s397_s30 = int_to_ptr.hbm [resolvable:$true] %s396_s30 }
  0x30   : > { %s1088_s19 = sshra.s32 %s397_s30, 4  ;;  %s1089_s19 = int_to_ptr.hbm [resolvable:$true] %s1088_s19 }
  0x31   : > { %s1090_s15 = scalar_lea.hbm %s1089_s19, 1  ;;  %p1096_p13 = scmp.lt.s32.totalorder %s1089_s19, %s1705_s1 }
  0x32   : > { %p1091_p8 = scmp.ne.s32.totalorder %s1089_s19, %s1090_s15  ;;  %p1097_p0 = scmp.lt.s32.totalorder %s1095_s18, %s1090_s15 }
  0x34   : > { %p1093_p10 = pnand %p1092_p9, %p1091_p8  ;;  %p1098_p2 = por %p1097_p0, %p1096_p13 }
  0x36   : > { %p1094_p11 = pneg %p1093_p10 }
  0x38   : > { %p1099_p1 = pnand %p1098_p2, %p1094_p11 }
  0x3a   : > { %1102 = shalt.err (!%p1099_p1)
}
  0x3b   : > { %963 = dma.hbm_to_vmem [thread:$0]  (!%p1500_p7), %s397_s30, 16, %s399_s3, %s1510_s6  }
  0x3c   : > { %s1706_s5 = sld [smem:[#allocation29_spill]]  ;;  %s1354_s12 = smov [#allocation10]  }
  0x3d   : > { %s326_s19 = sshll.u32 %s1354_s12, 4  ;;  %s1707_s7 = sld [smem:[#allocation31_spill]]  ;;  %s327_s19 = int_to_ptr.vmem [resolvable:$true] %s326_s19 }
  0x3e   : > { %s1708_s11 = smov 8   ;;  %s1709_s1 = smov 128  }
  0x3f   : > { %s1355_s3 = smov [#allocation13]   ;;  %s377_s12 = scalar_lea.hbm %s1668_s0, %s1348_s16 }
  0x40   : > { %s354_s30 = sshll.u32 %s1355_s3, 4  ;;  %s374_s15 = scalar_lea.vmem [#allocation2], %s1490_s24  ;;  %s355_s30 = int_to_ptr.vmem [resolvable:$true] %s354_s30 }
  0x41   : > { %s381_s18 = sshll.u32 %s374_s15, 4  ;;  %s382_s18 = int_to_ptr.vmem [resolvable:$true] %s381_s18 }
  0x42   : > { %s324_s17 = sshll.u32 %s1706_s5, 4  ;;  %s379_s5 = sshll.u32 %s377_s12, 4  ;;  %s325_s17 = int_to_ptr.hbm [resolvable:$true] %s324_s17  ;;  %s380_s5 = int_to_ptr.hbm [resolvable:$true] %s379_s5 }
  0x43   : > { %s352_s22 = sshll.u32 %s1707_s7, 4  ;;  %s1178_s7 = sshra.s32 %s380_s5, 4  ;;  %s353_s22 = int_to_ptr.hbm [resolvable:$true] %s352_s22  ;;  %s1179_s7 = int_to_ptr.hbm [resolvable:$true] %s1178_s7 }
  0x44   : > { %950 = dma.hbm_to_vmem [thread:$0]  (!%p1452_p6), %s325_s17, 512, %s327_s19, [#allocation9], %s1709_s1, %s1709_s1, %s1708_s11  }
  0x45   : > { %956 = dma.hbm_to_vmem [thread:$0]  (!%p1452_p6), %s353_s22, 256, %s355_s30, [#allocation12], %s1709_s1, %s1709_s1, %s1708_s11  }
  0x46   : > { %s901_s17 = sshll.u32 %s1490_s24, 3  ;;  %s372_s19 = scalar_lea.sflag [#allocation3], %s1490_s24 }
  0x47   : > { %s1180_s3 = scalar_lea.hbm %s1179_s7, 1  ;;  %s1185_s22 = scalar_lea.hbm %s1668_s0, 2 }
  0x48   : > { %p1181_p1 = scmp.ne.s32.totalorder %s1179_s7, %s1180_s3  ;;  %p1186_p6 = scmp.lt.s32.totalorder %s1179_s7, %s1668_s0 }
  0x49   : > { %p1187_p11 = scmp.lt.s32.totalorder %s1185_s22, %s1180_s3 }
  0x4a   : > { %p1183_p8 = pnand %p1181_p1, %p1092_p9 }
  0x4b   : > { %p1188_p13 = por %p1187_p11, %p1186_p6 }
  0x4c   : > { %p1184_p10 = pneg %p1183_p8 }
  0x4e   : > { %p1189_p0 = pnand %p1188_p13, %p1184_p10 }
  0x50   : > { %1192 = shalt.err (!%p1189_p0)
}
  0x51   : > { %960 = dma.hbm_to_vmem [thread:$0]  (!%p1500_p7), %s380_s5, 16, %s382_s18, %s372_s19  }
  0x52   : > { %s902_s24 = sshll.u32 %s1348_s16, 3  ;;  %s409_s15 = scalar_lea.vmem [#allocation7], %s901_s17 }
  0x53   : > { %s413_s12 = scalar_lea.hbm %s1670_s2, %s902_s24  ;;  %s417_s1 = sshll.u32 %s409_s15, 4  ;;  %s418_s1 = int_to_ptr.vmem [resolvable:$true] %s417_s1 }
  0x54   : > { %s415_s27 = sshll.u32 %s413_s12, 4  ;;  %s1215_s18 = scalar_lea.hbm %s1670_s2, 16  ;;  %s416_s27 = int_to_ptr.hbm [resolvable:$true] %s415_s27 }
  0x55   : > { %s1208_s7 = sshra.s32 %s416_s27, 4  ;;  %s1209_s7 = int_to_ptr.hbm [resolvable:$true] %s1208_s7 }
  0x56   : > { %s1210_s3 = scalar_lea.hbm %s1209_s7, 8  ;;  %p1216_p10 = scmp.lt.s32.totalorder %s1209_s7, %s1670_s2 }
  0x57   : > { %p1211_p2 = scmp.ne.s32.totalorder %s1209_s7, %s1210_s3  ;;  %p1217_p6 = scmp.lt.s32.totalorder %s1215_s18, %s1210_s3 }
  0x59   : > { %p1213_p1 = pnand %p1211_p2, %p1092_p9  ;;  %p1218_p11 = por %p1217_p6, %p1216_p10 }
  0x5b   : > { %p1214_p8 = pneg %p1213_p1 }
  0x5d   : > { %p1219_p13 = pnand %p1218_p11, %p1214_p8 }
  0x5f   : > { %1222 = shalt.err (!%p1219_p13)
}
  0x60   : > { %966 = dma.hbm_to_vmem [thread:$0]  (!%p1500_p7), %s416_s27, 128, %s418_s1, %s1510_s6  }
  0x61   : > { %426 = sbr.rel (%p1440_p3) target bundleno = 908 (0x38c), region = 56  ;;  %s1579_s17 = sand.u32 (!%p1440_p3), 1, %s1340_s14  }
  0x62   : > { %s429_s30 = scalar_lea.sflag (!%p1440_p3), [#allocation3], %s1579_s17  ;;  %s431_s24 = scalar_lea.vmem (!%p1440_p3), [#allocation2], %s1579_s17 }
  0x66   : > { %1311 = dma.done.wait (%p1483_p12), %s429_s30, 16  }
  0x67   : > { %1313 = vsyncadd (%p1483_p12), %s429_s30, 4294967280  ;;  %s437_s6 = sand.u32 1, %s1435_s20   ;;  %s440_s21 = scalar_lea.vmem [#allocation5], %s1579_s17 }
  0x68   : > { %s438_s28 = scalar_lea.sflag [#allocation6], %s437_s6 }
  0x69   : > { %1315 = dma.done.wait (%p1483_p12), %s438_s28, 144  }
  0x6a   : > { %1317 = vsyncadd (%p1483_p12), %s438_s28, 4294967152  ;;  %s904_s26 = sshll.u32 %s1579_s17, 3  ;;  %p1710_p3 = scmp.eq.s32.totalorder %s1435_s20, 0 }
  0x6b   : > { %s450_s29 = scalar_lea.vmem [#allocation7], %s904_s26 }
  0x6c   : > { %1319 = dma.done.wait (%p1710_p3), [#allocation9], 1024   ;;  %p1711_p7 = pmov %p1710_p3 }
  0x6d   : > { %p1712_p9 = pmov %p1710_p3 }
  0x6e   : > { %1321 = vsyncadd (%p1711_p7), [#allocation9], 4294966272 }
  0x6f   : > { %1323 = dma.done.wait (%p1712_p9), [#allocation12], 768   ;;  %p1713_p0 = pmov %p1710_p3 }
  0x70   : > { %v525_v0 = vld [vmem:[#allocation8 + $0x18] sm:$0xff]  ;;  %v524_v1 = vld [vmem:[#allocation8 + $0x10] sm:$0xff]  ;;  %v523_v2 = vld [vmem:[#allocation8 + $0x8] sm:$0xff]  ;;  %vm527_vm0 = vcmask 261120   ;;  %vm577_vm1 = vcmask 57344   ;;  %vm590_vm2 = vcmask 64512   ;;  %s723_s7 = scalar_lea.hbm %s1678_s10, %s1435_s20 }
  0x71   : > { %1325 = vsyncadd (%p1713_p0), [#allocation12], 4294966528  ;;  %543 = vmatpush.msra.mxu0 %v525_v0  ;;  %v522_v3 = vld [vmem:[#allocation8] sm:$0xff]  ;;  %v519_v4 = vld [vmem:[%s431_s24] sm:$0x1]  ;;  %s518_s15 = scalar_lea.vmem [#allocation15], %s1579_s17 }
  0x72   : > { %v521_v5 = vld [vmem:[%s450_s29] sm:$0xff]  ;;  %v526_v6 = vld [vmem:[%s1672_s4] sm:$0x1]  ;;  %v614_v22 = vld [vmem:[#allocation10] sm:$0xff]  ;;  %vm667_vm3 = vcmask 130048   ;;  %s725_s3 = sshll.u32 %s518_s15, 4  ;;  %s726_s3 = int_to_ptr.vmem [resolvable:$true] %s725_s3 }
  0x73   : > { %544 = vmatpush.msra.mxu0 %v524_v1  ;;  %910 = vmatpush.xpose.msk.msra.mxu1 %vm527_vm0, %v521_v5  ;;  %v617_v16 = vld [vmem:[#allocation10 + $0x18] sm:$0xff]  ;;  %v616_v18 = vld [vmem:[#allocation10 + $0x10] sm:$0xff]  ;;  %v615_v20 = vld [vmem:[#allocation10 + $0x8] sm:$0xff]  ;;  %s727_s22 = sshll.u32 %s723_s7, 4  ;;  %s702_s5 = scalar_lea.sflag [#allocation16], %s1579_s17  ;;  %s728_s22 = int_to_ptr.hbm [resolvable:$true] %s727_s22 }
  0x74   : > { %609 = vmatpush.msra.mxu2 %v521_v5  ;;  %v621_v17 = vld [vmem:[#allocation11 + $0x18] sm:$0xff]  ;;  %v620_v19 = vld [vmem:[#allocation11 + $0x10] sm:$0xff]  ;;  %v619_v21 = vld [vmem:[#allocation11 + $0x8] sm:$0xff]  ;;  %s1252_s18 = sshra.s32 %s728_s22, 4  ;;  %s1258_s24 = scalar_lea.hbm %s1678_s10, 2  ;;  %s1253_s18 = int_to_ptr.hbm [resolvable:$true] %s1252_s18 }
  0x75   : > { %545 = vmatpush.msra.mxu0 %v523_v2  ;;  %634 = vmatpush.msra.mxu3 %v621_v17  ;;  %v618_v26 = vld [vmem:[#allocation11] sm:$0xff]  ;;  %v666_v27 = vld [vmem:[#allocation13 + $0x8] sm:$0xff]  ;;  %s1254_s19 = scalar_lea.hbm %s1253_s18, 1  ;;  %p1259_p8 = scmp.lt.s32.totalorder %s1253_s18, %s1678_s10 }
  0x76   : > { %657 = vmatpush.msrb.mxu2 %v617_v16  ;;  %v665_v28 = vld [vmem:[#allocation13] sm:$0xff]  ;;  %v520_v29 = vld [vmem:[%s440_s21] sm:$0x1]  ;;  %p1255_p12 = scmp.ne.s32.totalorder %s1253_s18, %s1254_s19  ;;  %p1260_p10 = scmp.lt.s32.totalorder %s1258_s24, %s1254_s19 }
  0x77   : > { %546 = vmatpush.msra.mxu0 %v522_v3  ;;  %635 = vmatpush.msra.mxu3 %v620_v19 }
  0x78   : > { %909 = vmatmul.msk.f32.vlgmr.msra.gmra.mxu0 %vm527_vm0, %v519_v4  ;;  %658 = vmatpush.msrb.mxu2 %v616_v18  ;;  %p1256_p2 = pnand %p1255_p12, %p1492_p4  ;;  %p1261_p6 = por %p1260_p10, %p1259_p8 }
  0x79   : > { %636 = vmatpush.msra.mxu3 %v619_v21  ;;  %685 = vmatpush.msrb.mxu1 %v666_v27 }
  0x7a   : > { %659 = vmatpush.msrb.mxu2 %v615_v20  ;;  %p1257_p1 = pneg %p1256_p2 }
  0x7b   : > { %637 = vmatpush.msra.mxu3 %v618_v26  ;;  %686 = vmatpush.msrb.mxu1 %v665_v28 }
  0x7c   : > { %660 = vmatpush.msrb.mxu2 %v614_v22  ;;  %913 = vmatmul.msk.f32.vlgmr.msra.gmra.mxu3 %vm527_vm0, %v519_v4  ;;  %p1262_p11 = pnand %p1261_p6, %p1257_p1 }
  0xf5   : > { %v548_v7 = vpop.f32.mrf.mxu0 }
  0xf6   : > { %v549_v8 = vadd.f32 %v548_v7, %v526_v6 }
  0xf8   : > { %911 = vmatmul.msk.f32.vlgmr.msra.gmra.mxu1 %vm527_vm0, %v549_v8 }
 0x100   : > { %915 = vmatmul.msk.f32.vlgmr.msrb.gmra.mxu1 %vm667_vm3, %v520_v29 }
 0x175   : > { %v574_v9 = vpop.f32.mrf.mxu1 }
 0x176   : > { %v578_v10 = vsel %vm577_vm1, %v574_v9, -inf }
 0x177   : > { %579 = vmax.xlane.f32.xlu0 %v578_v10 }
 0x1ea   : > { %v580_v11 = vpop.xlane.xlu0 %579 }
 0x1eb   : > { %v581_v12 = vsub.f32 %v574_v9, %v580_v11 }
 0x1ed   : > { %v582_v13 = vmul.f32 1.442695, %v581_v12 }
 0x1ef   : > { %1022 = vpow2.f32 %v582_v13 }
 0x1f5   : > { %v1023_v14 = vpop.eup %1022 }
 0x1f6   : > { %v584_v15 = vsel %vm577_vm1, %v1023_v14, 0.0 }
 0x1f7   : > { %585 = vadd.xlane.f32.xlu0 %v584_v15 }
 0x26a   : > { %v586_v23 = vpop.xlane.xlu0 %585 }
 0x26b   : > { %1024 = vrcp.f32 %v586_v23 }
 0x271   : > { %v1025_v24 = vpop.eup %1024 }
 0x272   : > { %v588_v25 = vmul.f32 %v1025_v24, %v1023_v14 }
 0x274   : > { %912 = vmatmul.msk.f32.vlgmr.msra.gmra.mxu2 %vm590_vm2, %v588_v25  ;;  %589 = vst.msk [vmem:[%s518_s15] sm:$0x1] %vm577_vm1, %v588_v25 }
 0x2f7   : > { %v611_v30 = vpop.f32.mrf.mxu2 }
 0x2f8   : > { %914 = vmatmul.msk.f32.vlgmr.msrb.gmra.mxu2 %vm527_vm0, %v611_v30 }
 0x2f9   : > { %1265 = shalt.err (!%p1262_p11)
}
 0x2fa   : > { %941 = dma.vmem_to_hbm [thread:$0]  (%p1492_p4), %s726_s3, 16, %s728_s22, %s702_s5   ;;  %v639_v31 = vpop.f32.mrf.mxu3  ;;  %v688_v33 = vpop.f32.mrf.mxu1  ;;  %v692_v35 = vld [vmem:[%s1676_s8] sm:$0x1]  ;;  %vm695_vm4 = vcmask 253952  }
 0x2fb   : > { %s710_s12 = scalar_lea.hbm %s1677_s9, %s1435_s20  ;;  %s512_s15 = scalar_lea.vmem [#allocation14], %s1579_s17 }
 0x2fc   : > { %s712_s1 = sshll.u32 %s512_s15, 4  ;;  %s714_s27 = sshll.u32 %s710_s12, 4  ;;  %s713_s1 = int_to_ptr.vmem [resolvable:$true] %s712_s1  ;;  %s715_s27 = int_to_ptr.hbm [resolvable:$true] %s714_s27 }
 0x2fd   : > { %s698_s7 = scalar_lea.sflag [#allocation4], %s1579_s17  ;;  %s1280_s3 = sshra.s32 %s715_s27, 4  ;;  %s1281_s3 = int_to_ptr.hbm [resolvable:$true] %s1280_s3 }
 0x2fe   : > { %s1282_s22 = scalar_lea.hbm %s1281_s3, 1  ;;  %s1286_s20 = scalar_lea.hbm %s1677_s9, 2 }
 0x2ff   : > { %p1283_p13 = scmp.ne.s32.totalorder %s1281_s3, %s1282_s22  ;;  %p1287_p9 = scmp.lt.s32.totalorder %s1281_s3, %s1677_s9 }
 0x300   : > { %p1288_p0 = scmp.lt.s32.totalorder %s1286_s20, %s1282_s22 }
 0x301   : > { %p1284_p3 = pnand %p1283_p13, %p1492_p4 }
 0x302   : > { %p1289_p12 = por %p1288_p0, %p1287_p9 }
 0x303   : > { %p1285_p7 = pneg %p1284_p3 }
 0x305   : > { %p1290_p2 = pnand %p1289_p12, %p1285_p7 }
 0x37b   : > { %v662_v32 = vpop.f32.mrf.mxu2 }
 0x37c   : > { %v663_v34 = vadd.f32 %v662_v32, %v639_v31 }
 0x37e   : > { %v691_v36 = vadd.f32 %v688_v33, %v663_v34 }
 0x380   : > { %v693_v37 = vadd.f32 %v692_v35, %v691_v36 }
 0x382   : > { %1026 = vtanh.f32 %v693_v37 }
 0x388   : > { %v1027_v38 = vpop.eup %1026 }
 0x389   : > { %696 = vst.msk [vmem:[%s512_s15] sm:$0x1] %vm695_vm4, %v1027_v38 }
 0x38a   : > { %1293 = shalt.err (!%p1290_p2)
}
 0x38b   : > { %940 = dma.vmem_to_hbm [thread:$0]  (%p1492_p4), %s713_s1, 16, %s715_s27, %s698_s7  }
 0x38c PF: > { %s739_s30 = sand.u32 1, %s1336_s13   ;;  %p1715_p1 = scmp.ge.s32.totalorder %s1348_s16, 2 }
 0x38d   : > { %s740_s24 = scalar_lea.sflag [#allocation4], %s739_s30 }
 0x38e   : > { %p968_p8 = pnand %p1715_p1, %p1496_p5 }
 0x390   : > { %p969_p10 = pneg %p968_p8 }
 0x392   : > { %1327 = dma.done.wait (%p969_p10), %s740_s24, 16  }
 0x393   : > { %1329 = vsyncadd (%p969_p10), %s740_s24, 4294967280  ;;  %s749_s6 = scalar_lea.sflag [#allocation16], %s739_s30 }
 0x394   : > { %1331 = dma.done.wait (%p969_p10), %s749_s6, 16  }
 0x395   : > { %1333 = vsyncadd (%p969_p10), %s749_s6, 4294967280  ;;  %s1716_s16 = sld [smem:[#allocation24_spill]]  ;;  %s1719_s13 = smov %s1340_s14 }
 0x396   : > { %s1717_s28 = sld [smem:[#allocation23_spill]] }
 0x397   : > { %s1718_s15 = sld [smem:[#allocation25_spill]] }
 0x39b   : > { %p32_p4 = scmp.ge.s32.totalorder %s1716_s16, 4  }
 0x39c   : > { %s1720_s14 = smov %s1717_s28 }
 0x39d   :  { %34 = sbr.rel (!%p32_p4) target bundleno = 17 (0x11), region = 158 }
 0x3a2   :  { %754 = vsyncpa [#allocation3], 1 }
 0x3a3   :  { %756 = vsyncpa [#allocation3 + $0x1], 1 }
 0x3a4   :  { %757 = vsyncpa [#allocation6], 1 }
 0x3a5   :  { %759 = vsyncpa [#allocation6 + $0x1], 1 }
 0x3a6   :  { %760 = vsyncpa [#allocation9], 1 }
 0x3a7   :  { %761 = vsyncpa [#allocation12], 1 }
 0x3a8   :  { %762 = vsyncpa [#allocation4], 1 }
 0x3a9   :  { %764 = vsyncpa [#allocation4 + $0x1], 1 }
 0x3aa   :  { %765 = vsyncpa [#allocation16], 1 }
 0x3ab   :  { %767 = vsyncpa [#allocation16 + $0x1], 1 }

</bundles_post_ra>
